<compile_context>
chip_gen: v6e
topology: v6e:2x2x1
jax: 0.10.0
libtpu: 0.0.40
codegen_flags: <defaults>
</compile_context>

<pallas_src>
import jax
import jax.numpy as jnp
from jax.experimental import pallas as pl
from jax.experimental.pallas import tpu as pltpu

LANE = 128
SUBLANE = 8
MAX_TILE_B = 2048        # cap: double-buffered f32 x tile fits v5e's 16 MiB scoped VMEM


def _round_up(n, m):
    return ((n + m - 1) // m) * m


def _cdiv(a, b):
    return (a + b - 1) // b


def _fused_mlp_kernel(x_ref, *refs):
    """refs = (w1, b1, w2, b2, ..., wn, bn, out_ref). ReLU after all but last."""
    out_ref = refs[-1]
    wb = refs[:-1]
    n_layers = len(wb) // 2
    # x arrives as f32; cast to bf16 here in VMEM (no wrapper HBM round-trip).
    h = x_ref[...].astype(jnp.bfloat16)             # (tile_b, 784)
    for i in range(n_layers):
        w = wb[2 * i][...]                          # bf16 (d_in_pad, d_out_pad)
        b = wb[2 * i + 1][...]                      # f32  (1, d_out_pad)
        y = jnp.dot(h, w, preferred_element_type=jnp.float32) + b
        if i < n_layers - 1:
            h = jnp.maximum(y, 0.0).astype(jnp.bfloat16)   # ReLU, bf16 for next MXU
        else:
            h = y                                          # final logits in f32
    out_ref[...] = h.astype(out_ref.dtype)          # bf16 writeback, 128-lane dense


def pad_and_cast_params(params):
    """Zero-pad each layer's output dim (and the next layer's input dim) to a
    multiple of 128 lanes. Weights -> bf16 (MXU operands); biases stay f32.
    Zero padding is exact math: zero cols + zero bias -> ReLU(0) = 0 feeds
    zero rows of the next padded weight."""
    padded = []
    prev_out_pad = None
    for (w, b) in params:
        d_in, d_out = w.shape
        d_in_pad = d_in if prev_out_pad is None else prev_out_pad
        d_out_pad = _round_up(d_out, LANE)
        w_p = jnp.zeros((d_in_pad, d_out_pad), jnp.float32)
        w_p = w_p.at[:d_in, :d_out].set(w)
        b_p = jnp.zeros((1, d_out_pad), jnp.float32).at[0, :d_out].set(b)
        padded.append((w_p.astype(jnp.bfloat16), b_p))
        prev_out_pad = d_out_pad
    return padded


def _choose_tiling(batch, target_tile_b):
    """Adaptive batch tiling:
      * padding waste bounded to < 8 rows per grid step,
      * >= 2 (ideally 4) grid steps once each tile can stay >= 512 rows
        (v7x megacore sharding without dropping below the ~85%-of-roofline
        tile size measured on v6e),
      * tile_b capped at MAX_TILE_B for v5e's scoped-VMEM limit."""
    target = min(max(_round_up(int(target_tile_b), SUBLANE), SUBLANE), MAX_TILE_B)
    n_steps = _cdiv(batch, target)
    if batch >= 4 * 512:
        n_steps = max(n_steps, 4)
    elif batch >= 2 * 512:
        n_steps = max(n_steps, 2)
    tile_b = _round_up(_cdiv(batch, n_steps), SUBLANE)
    b_pad = n_steps * tile_b
    return tile_b, b_pad


def mlp_forward(x, params, *, tile_b=1024):
    """Fused forward: x (B,1,28,28) f32 -> logits (B, num_classes) f32."""
    h = x.reshape(-1, 28 * 28)                      # matches torch reshape (view)
    B, d_in = h.shape
    num_classes = params[-1][0].shape[1]

    padded_params = pad_and_cast_params(params)
    d_out_pad = padded_params[-1][1].shape[1]

    tile_b, b_pad = _choose_tiling(B, tile_b)
    if b_pad > B:                                   # tiny remainder pad only
        h = jnp.pad(h, ((0, b_pad - B), (0, 0)))

    in_specs = [pl.BlockSpec((tile_b, d_in), lambda i: (i, 0))]
    flat_inputs = [h]
    for (w_p, b_p) in padded_params:
        in_specs.append(pl.BlockSpec(w_p.shape, lambda i: (0, 0)))   # VMEM-resident
        in_specs.append(pl.BlockSpec(b_p.shape, lambda i: (0, 0)))   # VMEM-resident
        flat_inputs.extend([w_p, b_p])

    flops = 2 * b_pad * sum(int(w.shape[0]) * int(w.shape[1])
                            for w, _ in padded_params)
    bytes_accessed = (b_pad * d_in * 4                                # x read (f32)
                      + sum(int(w.size) * 2 + int(b.size) * 4
                            for w, b in padded_params)                # params
                      + b_pad * d_out_pad * 2)                        # logits (bf16)

    out = pl.pallas_call(
        _fused_mlp_kernel,
        out_shape=jax.ShapeDtypeStruct((b_pad, d_out_pad), jnp.bfloat16),
        grid_spec=pl.GridSpec(
            grid=(b_pad // tile_b,),
            in_specs=in_specs,
            out_specs=pl.BlockSpec((tile_b, d_out_pad), lambda i: (i, 0)),
        ),
        compiler_params=pltpu.CompilerParams(
            dimension_semantics=("parallel",),
        ),
        cost_estimate=pl.CostEstimate(
            flops=int(flops), transcendentals=0,
            bytes_accessed=int(bytes_accessed)),
    )(*flat_inputs)

    # Slice off batch / lane padding; upcast the tiny logits slab for the consumer.
    return out[:B, :num_classes].astype(jnp.float32)


def init_mlp_params(key, hiddens, num_classes):
    """Mirror the PyTorch module's init shapes.

    Hidden Linear layers: xavier_normal_ weights, default-uniform biases.
    Final Linear layer: PyTorch default init (uniform +-1/sqrt(fan_in)).
    Weights stored as (in, out)."""
    params = []
    dims = list(hiddens) + [num_classes]
    for i in range(len(dims) - 1):
        fan_in, fan_out = dims[i], dims[i + 1]
        key, kw, kb = jax.random.split(key, 3)
        is_last = i == len(dims) - 2
        if not is_last:
            std = (2.0 / (fan_in + fan_out)) ** 0.5           # xavier normal
            w = std * jax.random.normal(kw, (fan_in, fan_out), dtype=jnp.float32)
        else:
            bound = 1.0 / (fan_in ** 0.5)
            w = jax.random.uniform(kw, (fan_in, fan_out), minval=-bound,
                                   maxval=bound, dtype=jnp.float32)
        bound = 1.0 / (fan_in ** 0.5)
        b = jax.random.uniform(kb, (fan_out,), minval=-bound, maxval=bound,
                               dtype=jnp.float32)
        params.append((w, b))
    return params


def _ref_bf16(x, params):
    """Same math as the kernel: bf16 operands, f32 accumulation."""
    h = x.reshape(-1, 28 * 28).astype(jnp.bfloat16)
    for i, (w, b) in enumerate(params):
        y = jnp.dot(h, w.astype(jnp.bfloat16),
                    preferred_element_type=jnp.float32) + b
        h = jnp.maximum(y, 0.0).astype(jnp.bfloat16) if i < len(params) - 1 else y
    return h


def _ref_f32(x, params):
    """Pure f32 forward — semantics of the PyTorch module."""
    h = x.reshape(-1, 28 * 28)
    for i, (w, b) in enumerate(params):
        h = h @ w + b
        if i < len(params) - 1:
            h = jnp.maximum(h, 0.0)
    return h


if __name__ == "__main__":
    key = jax.random.PRNGKey(0)
    key, kx, kx2 = jax.random.split(key, 3)

    hiddens = [784, 32, 32]
    num_classes = 10
    params = init_mlp_params(key, hiddens, num_classes)

    # Primary small check (batch=2, single grid step).
    x = jax.random.normal(kx, (2, 1, 28, 28), dtype=jnp.float32)
    out = jax.block_until_ready(mlp_forward(x, params))
    assert out.shape == (2, num_classes), out.shape
    # Reference 1: kernel math (bf16 operands / f32 accumulate, bf16 writeback).
    assert jnp.allclose(out, _ref_bf16(x, params), atol=3e-2, rtol=3e-2)
    # Reference 2: PyTorch-module f32 semantics (loose tol for bf16 MXU operands).
    assert jnp.allclose(out, _ref_f32(x, params), atol=1e-1, rtol=1e-1)

    # Exercise the multi-step grid + batch-remainder padding path (3 tiles of 16).
    x2 = jax.random.normal(kx2, (40, 1, 28, 28), dtype=jnp.float32)
    out2 = jax.block_until_ready(mlp_forward(x2, params, tile_b=16))
    assert out2.shape == (40, num_classes), out2.shape
    assert jnp.allclose(out2, _ref_bf16(x2, params), atol=3e-2, rtol=3e-2)
    assert jnp.allclose(out2, _ref_f32(x2, params), atol=1e-1, rtol=1e-1)

    print("KERNEL_OK")
</pallas_src>

<mosaic_0001>
module attributes {stable_mosaic.version = 11 : i64} {
  func.func @_fused_mlp_kernel(%arg0: i32, %arg1: memref<8x784xf32, #tpu.memory_space<vmem>>, %arg2: memref<784x128xbf16, #tpu.memory_space<vmem>>, %arg3: memref<1x128xf32, #tpu.memory_space<vmem>>, %arg4: memref<128x128xbf16, #tpu.memory_space<vmem>>, %arg5: memref<1x128xf32, #tpu.memory_space<vmem>>, %arg6: memref<128x128xbf16, #tpu.memory_space<vmem>>, %arg7: memref<1x128xf32, #tpu.memory_space<vmem>>, %arg8: memref<8x128xbf16, #tpu.memory_space<vmem>>) attributes {dimension_semantics = [#tpu.dimension_semantics<parallel>], iteration_bounds = array<i64: 1>, scalar_prefetch = 0 : i64, scratch_operands = 0 : i64, tpu.core_type = #tpu.core_type<tc>, window_params = [{transform_indices = @transform_0, window_bounds = array<i64: 8, 784>}, {pipeline_mode = #tpu.pipeline_mode<synchronous>, transform_indices = @transform_1, window_bounds = array<i64: 784, 128>}, {pipeline_mode = #tpu.pipeline_mode<synchronous>, transform_indices = @transform_2, window_bounds = array<i64: 1, 128>}, {pipeline_mode = #tpu.pipeline_mode<synchronous>, transform_indices = @transform_3, window_bounds = array<i64: 128, 128>}, {pipeline_mode = #tpu.pipeline_mode<synchronous>, transform_indices = @transform_4, window_bounds = array<i64: 1, 128>}, {pipeline_mode = #tpu.pipeline_mode<synchronous>, transform_indices = @transform_5, window_bounds = array<i64: 128, 128>}, {pipeline_mode = #tpu.pipeline_mode<synchronous>, transform_indices = @transform_6, window_bounds = array<i64: 1, 128>}, {transform_indices = @transform_7, window_bounds = array<i64: 8, 128>}]} {
    %c0 = arith.constant 0 : index
    %c0_0 = arith.constant 0 : index
    %0 = vector.load %arg1[%c0, %c0_0] : memref<8x784xf32, #tpu.memory_space<vmem>>, vector<8x784xf32>
    %1 = arith.truncf %0 : vector<8x784xf32> to vector<8x784xbf16>
    %c0_1 = arith.constant 0 : index
    %c0_2 = arith.constant 0 : index
    %2 = vector.load %arg2[%c0_1, %c0_2] : memref<784x128xbf16, #tpu.memory_space<vmem>>, vector<784x128xbf16>
    %c0_3 = arith.constant 0 : index
    %c0_4 = arith.constant 0 : index
    %3 = vector.load %arg3[%c0_3, %c0_4] : memref<1x128xf32, #tpu.memory_space<vmem>>, vector<1x128xf32>
    %cst = arith.constant dense<0.000000e+00> : vector<8x128xf32>
    %4 = tpu.matmul %1, %2, %cst {dimension_numbers = #tpu.dot_dimension_numbers<[1], [0], [0], [1], [0, 0, 1, 1], [], []>} : vector<8x784xbf16>, vector<784x128xbf16>, vector<8x128xf32> -> vector<8x128xf32>
    %5 = vector.broadcast %3 : vector<1x128xf32> to vector<8x128xf32>
    %6 = arith.addf %4, %5 : vector<8x128xf32>
    %cst_5 = arith.constant 0.000000e+00 : f32
    %7 = vector.broadcast %cst_5 : f32 to vector<8x128xf32>
    %8 = arith.maximumf %6, %7 : vector<8x128xf32>
    %9 = arith.truncf %8 : vector<8x128xf32> to vector<8x128xbf16>
    %c0_6 = arith.constant 0 : index
    %c0_7 = arith.constant 0 : index
    %10 = vector.load %arg4[%c0_6, %c0_7] : memref<128x128xbf16, #tpu.memory_space<vmem>>, vector<128x128xbf16>
    %c0_8 = arith.constant 0 : index
    %c0_9 = arith.constant 0 : index
    %11 = vector.load %arg5[%c0_8, %c0_9] : memref<1x128xf32, #tpu.memory_space<vmem>>, vector<1x128xf32>
    %cst_10 = arith.constant dense<0.000000e+00> : vector<8x128xf32>
    %12 = tpu.matmul %9, %10, %cst_10 {dimension_numbers = #tpu.dot_dimension_numbers<[1], [0], [0], [1], [0, 0, 1, 1], [], []>} : vector<8x128xbf16>, vector<128x128xbf16>, vector<8x128xf32> -> vector<8x128xf32>
    %13 = vector.broadcast %11 : vector<1x128xf32> to vector<8x128xf32>
    %14 = arith.addf %12, %13 : vector<8x128xf32>
    %cst_11 = arith.constant 0.000000e+00 : f32
    %15 = vector.broadcast %cst_11 : f32 to vector<8x128xf32>
    %16 = arith.maximumf %14, %15 : vector<8x128xf32>
    %17 = arith.truncf %16 : vector<8x128xf32> to vector<8x128xbf16>
    %c0_12 = arith.constant 0 : index
    %c0_13 = arith.constant 0 : index
    %18 = vector.load %arg6[%c0_12, %c0_13] : memref<128x128xbf16, #tpu.memory_space<vmem>>, vector<128x128xbf16>
    %c0_14 = arith.constant 0 : index
    %c0_15 = arith.constant 0 : index
    %19 = vector.load %arg7[%c0_14, %c0_15] : memref<1x128xf32, #tpu.memory_space<vmem>>, vector<1x128xf32>
    %cst_16 = arith.constant dense<0.000000e+00> : vector<8x128xf32>
    %20 = tpu.matmul %17, %18, %cst_16 {dimension_numbers = #tpu.dot_dimension_numbers<[1], [0], [0], [1], [0, 0, 1, 1], [], []>} : vector<8x128xbf16>, vector<128x128xbf16>, vector<8x128xf32> -> vector<8x128xf32>
    %21 = vector.broadcast %19 : vector<1x128xf32> to vector<8x128xf32>
    %22 = arith.addf %20, %21 : vector<8x128xf32>
    %23 = arith.truncf %22 : vector<8x128xf32> to vector<8x128xbf16>
    %c0_17 = arith.constant 0 : index
    %c0_18 = arith.constant 0 : index
    %24 = vector.load %arg8[%c0_17, %c0_18] : memref<8x128xbf16, #tpu.memory_space<vmem>>, vector<8x128xbf16>
    tpu.vector_store %arg8[%c0_17, %c0_18], %23 {strides = array<i32>} : memref<8x128xbf16, #tpu.memory_space<vmem>>, vector<8x128xbf16>,
    return
  }
  func.func @transform_0(%arg0: i32) -> (i32, i32) {
    %c0_i32 = arith.constant 0 : i32
    %c0_i32_0 = arith.constant 0 : i32
    return %arg0, %c0_i32 : i32, i32
  }
  func.func @transform_1(%arg0: i32) -> (i32, i32) {
    %c0_i32 = arith.constant 0 : i32
    %c0_i32_0 = arith.constant 0 : i32
    %c0_i32_1 = arith.constant 0 : i32
    return %c0_i32, %c0_i32_0 : i32, i32
  }
  func.func @transform_2(%arg0: i32) -> (i32, i32) {
    %c0_i32 = arith.constant 0 : i32
    %c0_i32_0 = arith.constant 0 : i32
    %c0_i32_1 = arith.constant 0 : i32
    return %c0_i32, %c0_i32_0 : i32, i32
  }
  func.func @transform_3(%arg0: i32) -> (i32, i32) {
    %c0_i32 = arith.constant 0 : i32
    %c0_i32_0 = arith.constant 0 : i32
    %c0_i32_1 = arith.constant 0 : i32
    return %c0_i32, %c0_i32_0 : i32, i32
  }
  func.func @transform_4(%arg0: i32) -> (i32, i32) {
    %c0_i32 = arith.constant 0 : i32
    %c0_i32_0 = arith.constant 0 : i32
    %c0_i32_1 = arith.constant 0 : i32
    return %c0_i32, %c0_i32_0 : i32, i32
  }
  func.func @transform_5(%arg0: i32) -> (i32, i32) {
    %c0_i32 = arith.constant 0 : i32
    %c0_i32_0 = arith.constant 0 : i32
    %c0_i32_1 = arith.constant 0 : i32
    return %c0_i32, %c0_i32_0 : i32, i32
  }
  func.func @transform_6(%arg0: i32) -> (i32, i32) {
    %c0_i32 = arith.constant 0 : i32
    %c0_i32_0 = arith.constant 0 : i32
    %c0_i32_1 = arith.constant 0 : i32
    return %c0_i32, %c0_i32_0 : i32, i32
  }
  func.func @transform_7(%arg0: i32) -> (i32, i32) {
    %c0_i32 = arith.constant 0 : i32
    %c0_i32_0 = arith.constant 0 : i32
    return %arg0, %c0_i32 : i32, i32
  }
}

</mosaic_0001>

<bundles_post_ra>
// kernel: tpu_custom_call.1
= control target key start
LH: loop header
LB: loop body
LE: loop exit
PB: predicated region body
PF: predicated region fallthrough
CT: control target
= control target key end

     0   :  { %12 = vsyncpa [#allocation3], 0  ;;  %s1391_s0 = inlined_call_operand.hbm [shape: f32[8,784], index: 0, kind: input, shape index: {}]   ;;  %s1392_s1 = inlined_call_operand.hbm [shape: bf16[784,128], index: 1, kind: input, shape index: {}]   ;;  %s1393_s2 = inlined_call_operand.vmem [shape: f32[1,128], index: 2, kind: input, shape index: {}]   ;;  %s1394_s3 = inlined_call_operand.hbm [shape: bf16[128,128], index: 3, kind: input, shape index: {}]   ;;  %s1395_s4 = inlined_call_operand.vmem [shape: f32[1,128], index: 4, kind: input, shape index: {}]   ;;  %s1396_s5 = inlined_call_operand.hbm [shape: bf16[128,128], index: 5, kind: input, shape index: {}]   ;;  %s1397_s6 = inlined_call_operand.vmem [shape: f32[1,128], index: 6, kind: input, shape index: {}]   ;;  %s1398_s7 = inlined_call_operand.hbm [shape: bf16[8,128], index: 7, kind: output, shape index: {}]  }
   0x1   :  { %13 = vsyncpa [#allocation6], 0 }
   0x2   :  { %14 = vsyncpa [#allocation9], 0 }
   0x3   :  { %15 = vsyncpa [#allocation4], 0  ;;  %s1286_s24 = smov [#allocation5]  }
   0x4   :  { %s31_s25 = sshll.u32 %s1286_s24, 4  ;;  %s32_s25 = int_to_ptr.vmem [resolvable:$true] %s31_s25 }
   0x5   :  { %s1186_s26 = scalar_lea.vmem %s32_s25, 6272  ;;  %p1191_p1 = scmp.lt.s32.totalorder %s32_s25, %s32_s25 }
   0x6   :  { %p1187_p0 = scmp.ne.s32.totalorder %s32_s25, %s1186_s26  ;;  %p1192_p2 = scmp.lt.s32.totalorder %s1186_s26, %s1186_s26 }
   0x8   :  { %p1193_p3 = por %p1192_p2, %p1191_p1 }
   0xa   :  { %p1194_p4 = pnand %p1193_p3, %p1187_p0 }
   0xc   :  { %1197 = shalt.err (!%p1194_p4)
}
   0xd   :  { %s1287_s27 = smov 64   ;;  %s1288_s28 = smov 4  }
   0xe   :  { %37 = dma.hbm_to_vmem [thread:$0]  %s1392_s1, 6272, %s32_s25, [#allocation6], %s1287_s27, %s1287_s27, %s1288_s28  }
   0xf   :  { %s1289_s8 = smov [#allocation2]   ;;  %s1290_s10 = smov [#allocation7]  }
  0x10   :  { %s22_s9 = sshll.u32 %s1289_s8, 4  ;;  %s45_s11 = sshll.u32 %s1290_s10, 4  ;;  %s23_s9 = int_to_ptr.vmem [resolvable:$true] %s22_s9  ;;  %s46_s11 = int_to_ptr.vmem [resolvable:$true] %s45_s11 }
  0x11   :  { %s1206_s12 = scalar_lea.vmem %s23_s9, 896  ;;  %p1211_p6 = scmp.lt.s32.totalorder %s23_s9, %s23_s9 }
  0x12   :  { %p1207_p5 = scmp.ne.s32.totalorder %s23_s9, %s1206_s12  ;;  %p1212_p7 = scmp.lt.s32.totalorder %s1206_s12, %s1206_s12 }
  0x14   :  { %p1213_p8 = por %p1212_p7, %p1211_p6 }
  0x16   :  { %p1214_p9 = pnand %p1213_p8, %p1207_p5 }
  0x18   :  { %1217 = shalt.err (!%p1214_p9)
}
  0x19   :  { %25 = dma.hbm_to_vmem [thread:$0]  %s1391_s0, 896, %s23_s9, [#allocation3]  }
  0x1a   :  { %s1226_s15 = scalar_lea.vmem %s46_s11, 1024  ;;  %p1231_p11 = scmp.lt.s32.totalorder %s46_s11, %s46_s11 }
  0x1b   :  { %p1227_p10 = scmp.ne.s32.totalorder %s46_s11, %s1226_s15  ;;  %p1232_p12 = scmp.lt.s32.totalorder %s1226_s15, %s1226_s15 }
  0x1d   :  { %p1233_p13 = por %p1232_p12, %p1231_p11 }
  0x1f   :  { %p1234_p0 = pnand %p1233_p13, %p1227_p10 }
  0x21   :  { %1237 = shalt.err (!%p1234_p0)
}
  0x22   :  { %51 = dma.hbm_to_vmem [thread:$0]  %s1394_s3, 1024, %s46_s11, [#allocation6], %s1287_s27, %s1287_s27, %s1288_s28  }
  0x23   :  { %s1291_s17 = smov [#allocation8]  }
  0x24   :  { %s59_s18 = sshll.u32 %s1291_s17, 4  ;;  %s60_s18 = int_to_ptr.vmem [resolvable:$true] %s59_s18 }
  0x25   :  { %s1246_s19 = scalar_lea.vmem %s60_s18, 1024  ;;  %p1251_p2 = scmp.lt.s32.totalorder %s60_s18, %s60_s18 }
  0x26   :  { %p1247_p1 = scmp.ne.s32.totalorder %s60_s18, %s1246_s19  ;;  %p1252_p3 = scmp.lt.s32.totalorder %s1246_s19, %s1246_s19 }
  0x28   :  { %p1253_p4 = por %p1252_p3, %p1251_p2 }
  0x2a   :  { %p1254_p5 = pnand %p1253_p4, %p1247_p1 }
  0x2c   :  { %1257 = shalt.err (!%p1254_p5)
}
  0x2d   :  { %65 = dma.hbm_to_vmem [thread:$0]  %s1396_s5, 1024, %s60_s18, [#allocation9], %s1287_s27, %s1287_s27, %s1288_s28  }
  0x2e   :  { %1278 = dma.done.wait [#allocation3], 896  }
  0x2f   :  { %1279 = vsyncadd [#allocation3], 4294966400 }
  0x30   :  { %1280 = dma.done.wait [#allocation6], 7296  }
  0x31   :  { %1281 = vsyncadd [#allocation6], 4294960000 }
  0x32   :  { %1282 = dma.done.wait [#allocation9], 1024  }
  0x33   :  { %1283 = vsyncadd [#allocation9], 4294966272  ;;  %v1113_v0 = vld [vmem:[#allocation5 + $0x78] sm:$0xff]   ;;  %v1117_v4 = vld [vmem:[#allocation5 + $0x70] sm:$0xff]   ;;  %v1292_v44 = vmov 0.0   ;;  %vm1293_vm0 = vmmov 0  }
  0x34   :  { %v1114_v1 = vld [vmem:[#allocation5 + $0x38] sm:$0xff]   ;;  %972 = vmatprep.subr.bf16.mxu0 %v1113_v0  ;;  %v1118_v5 = vld [vmem:[#allocation5 + $0x30] sm:$0xff]   ;;  %v1121_v8 = vld [vmem:[#allocation5 + $0x68] sm:$0xff]   ;;  %vm494_vm1 = vcmask 130048   ;;  %s1294_s24 = smov [#allocation10]  }
  0x35   :  { %v1115_v2 = vld [vmem:[#allocation5 + $0xf8] sm:$0xff]   ;;  %973 = vmatpush3.bf16.msra.mxu0 %v1114_v1  ;;  %v1119_v6 = vld [vmem:[#allocation5 + $0xf0] sm:$0xff]   ;;  %v1122_v9 = vld [vmem:[#allocation5 + $0x28] sm:$0xff]   ;;  %s892_s25 = sshll.u32 %s1294_s24, 4  ;;  %s893_s25 = int_to_ptr.vmem [resolvable:$true] %s892_s25 }
  0x36   :  { %v1116_v3 = vld [vmem:[#allocation5 + $0xb8] sm:$0xff]   ;;  %994 = vmatprep.subr.bf16.mxu1 %v1115_v2  ;;  %974 = vmatprep.subr.bf16.mxu0 %v1117_v4  ;;  %v1120_v7 = vld [vmem:[#allocation5 + $0xb0] sm:$0xff]   ;;  %v1123_v10 = vld [vmem:[#allocation5 + $0xe8] sm:$0xff]   ;;  %p1263_p7 = scmp.lt.s32.totalorder %s893_s25, %s893_s25 }
  0x37   :  { %995 = vmatpush3.bf16.msra.mxu1 %v1116_v3  ;;  %v1124_v11 = vld [vmem:[#allocation5 + $0xa8] sm:$0xff]   ;;  %v1125_v12 = vld [vmem:[#allocation5 + $0x60] sm:$0xff]   ;;  %v1129_v16 = vld [vmem:[#allocation5 + $0x58] sm:$0xff]  }
  0x38   :  { %996 = vmatprep.subr.bf16.mxu1 %v1119_v6  ;;  %v1126_v13 = vld [vmem:[#allocation5 + $0x20] sm:$0xff]   ;;  %v1130_v17 = vld [vmem:[#allocation5 + $0x18] sm:$0xff]   ;;  %v1133_v20 = vld [vmem:[#allocation5 + $0x50] sm:$0xff]  }
  0x39   :  { %975 = vmatpush3.bf16.msra.mxu0 %v1118_v5  ;;  %v1127_v14 = vld [vmem:[#allocation5 + $0xe0] sm:$0xff]   ;;  %v1131_v18 = vld [vmem:[#allocation5 + $0xd8] sm:$0xff]   ;;  %v1134_v21 = vld [vmem:[#allocation5 + $0x10] sm:$0xff]  }
  0x3a   :  { %976 = vmatprep.subr.bf16.mxu0 %v1121_v8  ;;  %v1128_v15 = vld [vmem:[#allocation5 + $0xa0] sm:$0xff]   ;;  %v1132_v19 = vld [vmem:[#allocation5 + $0x98] sm:$0xff]   ;;  %v1135_v22 = vld [vmem:[#allocation5 + $0xd0] sm:$0xff]  }
  0x3b   :  { %997 = vmatpush3.bf16.msra.mxu1 %v1120_v7  ;;  %v1136_v23 = vld [vmem:[#allocation5 + $0x90] sm:$0xff]   ;;  %v1137_v24 = vld [vmem:[#allocation5 + $0x48] sm:$0xff]   ;;  %v1141_v28 = vld [vmem:[#allocation5 + $0x40] sm:$0xff]  }
  0x3c   :  { %998 = vmatprep.subr.bf16.mxu1 %v1123_v10  ;;  %v1138_v25 = vld [vmem:[#allocation5 + $0x8] sm:$0xff]   ;;  %v1142_v29 = vld [vmem:[#allocation5] sm:$0xff]   ;;  %v82_v31 = vld [vmem:[#allocation2 + $0x8] sm:$0xff] }
  0x3d   :  { %977 = vmatpush3.bf16.msra.mxu0 %v1122_v9  ;;  %v1139_v26 = vld [vmem:[#allocation5 + $0xc8] sm:$0xff]   ;;  %v1143_v30 = vld [vmem:[#allocation5 + $0xc0] sm:$0xff]   ;;  %v89_v32 = vpack.c.bf16 %v82_v31, %v82_v31  ;;  %v1145_v36 = vld [vmem:[#allocation5 + $0x178] sm:$0xff]  }
  0x3e   :  { %978 = vmatprep.subr.bf16.mxu0 %v1125_v12  ;;  %v1140_v27 = vld [vmem:[#allocation5 + $0x88] sm:$0xff]   ;;  %v1144_v33 = vld [vmem:[#allocation5 + $0x80] sm:$0xff]   ;;  %v1146_v39 = vld [vmem:[#allocation5 + $0x138] sm:$0xff]  }
  0x3f   :  { %999 = vmatpush3.bf16.msra.mxu1 %v1124_v11  ;;  %v81_v34 = vld [vmem:[#allocation2] sm:$0xff]  ;;  %v84_v37 = vld [vmem:[#allocation2 + $0x18] sm:$0xff]  ;;  %530 = vmatprep.mubr.bf16.mxu0 %v89_v32  ;;  %v83_v40 = vld [vmem:[#allocation2 + $0x10] sm:$0xff] }
  0x40   :  { %1000 = vmatprep.subr.bf16.mxu1 %v1127_v14  ;;  %v88_v35 = vpack.c.bf16 %v81_v34, %v81_v34  ;;  %v91_v38 = vpack.c.bf16 %v84_v37, %v84_v37  ;;  %v90_v41 = vpack.c.bf16 %v83_v40, %v83_v40  ;;  %v1147_v42 = vld [vmem:[#allocation5 + $0x170] sm:$0xff]   ;;  %v1149_v45 = vld [vmem:[#allocation5 + $0x168] sm:$0xff]   ;;  %v1151_v47 = vld [vmem:[#allocation5 + $0x160] sm:$0xff]  }
  0x41   :  { %979 = vmatpush3.bf16.msra.mxu0 %v1126_v13  ;;  %v1148_v43 = vld [vmem:[#allocation5 + $0x130] sm:$0xff]   ;;  %v1150_v46 = vld [vmem:[#allocation5 + $0x128] sm:$0xff]   ;;  %v1152_v48 = vld [vmem:[#allocation5 + $0x120] sm:$0xff]  }
  0x42   :  { %980 = vmatprep.subr.bf16.mxu0 %v1129_v16  ;;  %570 = vmatprep.mubr.bf16.mxu1 %v91_v38  ;;  %v1153_v49 = vld [vmem:[#allocation5 + $0x158] sm:$0xff]   ;;  %v1155_v51 = vld [vmem:[#allocation5 + $0x150] sm:$0xff]   ;;  %v1161_v53 = vld [vmem:[#allocation5 + $0x180] sm:$0xff]  }
  0x43   :  { %1001 = vmatpush3.bf16.msra.mxu1 %v1128_v15  ;;  %v1154_v50 = vld [vmem:[#allocation5 + $0x118] sm:$0xff]   ;;  %v1156_v52 = vld [vmem:[#allocation5 + $0x110] sm:$0xff]   ;;  %v1157_v55 = vld [vmem:[#allocation5 + $0x148] sm:$0xff]  }
  0x44   :  { %1002 = vmatprep.subr.bf16.mxu1 %v1131_v18  ;;  %v86_v54 = vld [vmem:[#allocation2 + $0x28] sm:$0xff]  ;;  %v87_v57 = vld [vmem:[#allocation2 + $0x30] sm:$0xff]  ;;  %v1158_v59 = vld [vmem:[#allocation5 + $0x108] sm:$0xff]  }
  0x45   :  { %981 = vmatpush3.bf16.msra.mxu0 %v1130_v17  ;;  %v93_v56 = vpack.c.bf16 %v86_v54, %v86_v54  ;;  %v94_v58 = vpack.c.bf16 %v87_v57, %v87_v57  ;;  %v1159_v60 = vld [vmem:[#allocation5 + $0x140] sm:$0xff]   ;;  %v85_v62 = vld [vmem:[#allocation2 + $0x20] sm:$0xff]  ;;  %v1163_v1 = vld [vmem:[#allocation7 + $0x30] sm:$0xff]  }
  0x46   :  { %982 = vmatprep.subr.bf16.mxu0 %v1133_v20  ;;  %v1160_v61 = vld [vmem:[#allocation5 + $0x100] sm:$0xff]   ;;  %v92_v63 = vpack.c.bf16 %v85_v62, %v85_v62  ;;  %v1164_v2 = vld [vmem:[#allocation7 + $0x28] sm:$0xff]   ;;  %v1165_v3 = vld [vmem:[#allocation7 + $0x20] sm:$0xff]  }
  0x47   :  { %1003 = vmatpush3.bf16.msra.mxu1 %v1132_v19  ;;  %v1162_v0 = vld [vmem:[#allocation7 + $0x38] sm:$0xff]   ;;  %v1167_v5 = vld [vmem:[#allocation7 + $0x10] sm:$0xff]   ;;  %v1168_v6 = vld [vmem:[#allocation7 + $0x8] sm:$0xff]  }
  0x48   :  { %1004 = vmatprep.subr.bf16.mxu1 %v1135_v22  ;;  %v1166_v4 = vld [vmem:[#allocation7 + $0x18] sm:$0xff]   ;;  %v1169_v7 = vld [vmem:[#allocation7] sm:$0xff]   ;;  %v1171_v9 = vld [vmem:[#allocation8 + $0x30] sm:$0xff]  }
  0x49   :  { %983 = vmatpush3.bf16.msra.mxu0 %v1134_v21  ;;  %v1170_v8 = vld [vmem:[#allocation8 + $0x38] sm:$0xff]   ;;  %v1172_v10 = vld [vmem:[#allocation8 + $0x28] sm:$0xff]   ;;  %v1173_v11 = vld [vmem:[#allocation8 + $0x20] sm:$0xff]  }
  0x4a   :  { %984 = vmatprep.subr.bf16.mxu0 %v1137_v24  ;;  %v1174_v12 = vld [vmem:[#allocation8 + $0x18] sm:$0xff]   ;;  %v1175_v13 = vld [vmem:[#allocation8 + $0x10] sm:$0xff]   ;;  %v1176_v40 = vld [vmem:[#allocation8 + $0x8] sm:$0xff]  }
  0x4b   :  { %1005 = vmatpush3.bf16.msra.mxu1 %v1136_v23 }
  0x4c   :  { %1006 = vmatprep.subr.bf16.mxu1 %v1139_v26 }
  0x4d   :  { %985 = vmatpush3.bf16.msra.mxu0 %v1138_v25 }
  0x4e   :  { %986 = vmatprep.subr.bf16.mxu0 %v1141_v28 }
  0x4f   :  { %1007 = vmatpush3.bf16.msra.mxu1 %v1140_v27  ;;  %v903_v27 = vld [vmem:[%s1393_s2] ss:$0 sm:$0xff] }
  0x50   :  { %1008 = vmatprep.subr.bf16.mxu1 %v1143_v30 }
  0x51   :  { %987 = vmatpush3.bf16.msra.mxu0 %v1142_v29 }
  0x52   :  { %1016 = vmatprep.subr.bf16.mxu0 %v1145_v36 }
  0x53   :  { %1009 = vmatpush3.bf16.msra.mxu1 %v1144_v33 }
  0x54   :  { %531 = vmatmul.mubr.bf16.vlgmr.msra.gmra.mxu0 %v88_v35  ;;  %1058 = vmatprep.subr.bf16.mxu1 %v1292_v44 }
  0x55   :  { %1017 = vmatpush3.bf16.msra.mxu0 %v1146_v39  ;;  %610 = vmatprep.mubr.bf16.mxu0 %v93_v56 }
  0x56   :  { %571 = vmatmul.mubr.bf16.vlgmr.msra.gmra.mxu1 %v90_v41  ;;  %1018 = vmatprep.subr.bf16.mxu0 %v1147_v42  ;;  %v1177_v41 = vld [vmem:[#allocation8] sm:$0xff]  }
  0x57   :  { %1060 = vmatprep.mubr.msk.bf16.mxu1 %vm1293_vm0, %v1292_v44  ;;  %1059 = vmatpush3.bf16.msra.mxu1 %v1161_v53  ;;  %v954_v42 = vld [vmem:[%s1395_s4] ss:$0 sm:$0xff]  ;;  %s1258_s4 = scalar_lea.vmem %s893_s25, 64 }
  0x58   :  { %1064 = vmatprep.subr.bf16.mxu1 %v1292_v44  ;;  %p1259_p6 = scmp.ne.s32.totalorder %s893_s25, %s1258_s4  ;;  %p1264_p8 = scmp.lt.s32.totalorder %s1258_s4, %s1258_s4 }
  0x59   :  { %1019 = vmatpush3.bf16.msra.mxu0 %v1148_v43 }
  0x5a   :  { %1020 = vmatprep.subr.bf16.mxu0 %v1149_v45  ;;  %p1265_p9 = por %p1264_p8, %p1263_p7 }
  0x5c   :  { %p1266_p10 = pnand %p1265_p9, %p1259_p6 }
  0x5d   :  { %1021 = vmatpush3.bf16.msra.mxu0 %v1150_v46 }
  0x5e   :  { %1022 = vmatprep.subr.bf16.mxu0 %v1151_v47  ;;  %1061 = vmatmul.mubr.msk.bf16.vlgmr.msra.gmra.mxu1 %vm494_vm1, %v94_v58 }
  0x5f   :  { %1080 = vmatprep.mubr.msk.bf16.mxu1 %vm1293_vm0, %v1292_v44  ;;  %1065 = vmatpush3.bf16.msra.mxu1 %v1162_v0 }
  0x60   :  { %1066 = vmatprep.subr.bf16.mxu1 %v1292_v44 }
  0x61   :  { %1023 = vmatpush3.bf16.msra.mxu0 %v1152_v48 }
  0x62   :  { %1024 = vmatprep.subr.bf16.mxu0 %v1153_v49 }
  0x63   :  { %1067 = vmatpush3.bf16.msra.mxu1 %v1163_v1 }
  0x64   :  { %1068 = vmatprep.subr.bf16.mxu1 %v1292_v44 }
  0x65   :  { %1025 = vmatpush3.bf16.msra.mxu0 %v1154_v50 }
  0x66   :  { %1026 = vmatprep.subr.bf16.mxu0 %v1155_v51  ;;  %v963_v51 = vld [vmem:[%s1397_s6] ss:$0 sm:$0xff] }
  0x67   :  { %1069 = vmatpush3.bf16.msra.mxu1 %v1164_v2 }
  0x68   :  { %1070 = vmatprep.subr.bf16.mxu1 %v1292_v44 }
  0x69   :  { %1027 = vmatpush3.bf16.msra.mxu0 %v1156_v52 }
  0x6a   :  { %1028 = vmatprep.subr.bf16.mxu0 %v1157_v55 }
  0x6b   :  { %1071 = vmatpush3.bf16.msra.mxu1 %v1165_v3 }
  0x6c   :  { %1072 = vmatprep.subr.bf16.mxu1 %v1292_v44 }
  0x6d   :  { %1029 = vmatpush3.bf16.msra.mxu0 %v1158_v59 }
  0x6e   :  { %1030 = vmatprep.subr.bf16.mxu0 %v1159_v60 }
  0x6f   :  { %1073 = vmatpush3.bf16.msra.mxu1 %v1166_v4 }
  0x70   :  { %1074 = vmatprep.subr.bf16.mxu1 %v1292_v44 }
  0x71   :  { %1031 = vmatpush3.bf16.msra.mxu0 %v1160_v61 }
  0x72   :  { %1084 = vmatprep.subr.bf16.mxu0 %v1292_v44 }
  0x73   :  { %1075 = vmatpush3.bf16.msra.mxu1 %v1167_v5 }
  0x74   :  { %611 = vmatmul.mubr.bf16.vlgmr.msra.gmra.mxu0 %v92_v63  ;;  %1076 = vmatprep.subr.bf16.mxu1 %v1292_v44 }
  0x75   :  { %1100 = vmatprep.mubr.msk.bf16.mxu0 %vm1293_vm0, %v1292_v44  ;;  %1085 = vmatpush3.bf16.msra.mxu0 %v1170_v8 }
  0x76   :  { %1086 = vmatprep.subr.bf16.mxu0 %v1292_v44 }
  0x77   :  { %1077 = vmatpush3.bf16.msra.mxu1 %v1168_v6 }
  0x78   :  { %1078 = vmatprep.subr.bf16.mxu1 %v1292_v44 }
  0x79   :  { %1087 = vmatpush3.bf16.msra.mxu0 %v1171_v9 }
  0x7a   :  { %1088 = vmatprep.subr.bf16.mxu0 %v1292_v44 }
  0x7b   :  { %1079 = vmatpush3.bf16.msra.mxu1 %v1169_v7 }
  0x7d   :  { %1089 = vmatpush3.bf16.msra.mxu0 %v1172_v10 }
  0x7e   :  { %1090 = vmatprep.subr.bf16.mxu0 %v1292_v44 }
  0x81   :  { %1091 = vmatpush3.bf16.msra.mxu0 %v1173_v11 }
  0x82   :  { %1092 = vmatprep.subr.bf16.mxu0 %v1292_v44 }
  0x85   :  { %1093 = vmatpush3.bf16.msra.mxu0 %v1174_v12 }
  0x86   :  { %1094 = vmatprep.subr.bf16.mxu0 %v1292_v44 }
  0x89   :  { %1095 = vmatpush3.bf16.msra.mxu0 %v1175_v13 }
  0x8a   :  { %1096 = vmatprep.subr.bf16.mxu0 %v1292_v44 }
  0x8d   :  { %1097 = vmatpush3.bf16.msra.mxu0 %v1176_v40 }
  0x8e   :  { %1098 = vmatprep.subr.bf16.mxu0 %v1292_v44 }
  0x91   :  { %1099 = vmatpush3.bf16.msra.mxu0 %v1177_v41 }
 0x114   :  { %v988_v14 = vpop.f32.mrf.mxu0 }
 0x116   :  { %v989_v15 = vpop.f32.mrf.mxu0  ;;  %v1010_v16 = vpop.f32.mrf.mxu1 }
 0x117   :  { %v990_v26 = vadd.f32 %v989_v15, %v988_v14 }
 0x118   :  { %v991_v17 = vpop.f32.mrf.mxu0  ;;  %v1011_v18 = vpop.f32.mrf.mxu1 }
 0x119   :  { %v533_v28 = vadd.f32 %v990_v26, %v903_v27  ;;  %v1012_v29 = vadd.f32 %v1011_v18, %v1010_v16 }
 0x11a   :  { %v992_v19 = vpop.f32.mrf.mxu0  ;;  %v1013_v20 = vpop.f32.mrf.mxu1 }
 0x11b   :  { %v573_v32 = vadd.f32 %v1012_v29, %v533_v28 }
 0x11c   :  { %v1014_v21 = vpop.f32.mrf.mxu1 }
 0x11e   :  { %v652_v22 = vpop.f32.mrf.mxu1 }
 0x120   :  { %v1062_v23 = vpop.f32.mrf.mxu1 }
 0x122   :  { %v655_v24 = vpop.f32.mrf.mxu1 }
 0x124   :  { %v1063_v25 = vpop.f32.mrf.mxu1 }
 0x134   :  { %v1032_v30 = vpop.f32.mrf.mxu0 }
 0x136   :  { %v1033_v31 = vpop.f32.mrf.mxu0 }
 0x137   :  { %v1034_v33 = vadd.f32 %v1033_v31, %v1032_v30 }
 0x138   :  { %v1035_v34 = vpop.f32.mrf.mxu0 }
 0x139   :  { %v613_v35 = vadd.f32 %v1034_v33, %v573_v32 }
 0x13a   :  { %v1036_v36 = vpop.f32.mrf.mxu0 }
 0x13b   :  { %v653_v37 = vadd.f32 %v652_v22, %v613_v35 }
 0x13d   :  { %v658_v38 = vmax.f32 %v653_v37, 0.0 }
 0x13f   :  { %v659_v39 = vpack.c.bf16 %v658_v38, %v658_v38 }
 0x141   :  { %1081 = vmatmul.mubr.bf16.vlgmr.msra.gmra.mxu1 %v659_v39 }
 0x201   :  { %v765_v43 = vpop.f32.mrf.mxu1 }
 0x202   :  { %v766_v45 = vadd.f32 %v954_v42, %v765_v43 }
 0x203   :  { %v1082_v46 = vpop.f32.mrf.mxu1 }
 0x204   :  { %v771_v47 = vmax.f32 %v766_v45, 0.0 }
 0x205   :  { %v768_v48 = vpop.f32.mrf.mxu1 }
 0x206   :  { %v772_v49 = vpack.c.bf16 %v771_v47, %v771_v47 }
 0x207   :  { %v1083_v50 = vpop.f32.mrf.mxu1 }
 0x208   :  { %1101 = vmatmul.mubr.bf16.vlgmr.msra.gmra.mxu0 %v772_v49 }
 0x2c8   :  { %v878_v52 = vpop.f32.mrf.mxu0 }
 0x2c9   :  { %v879_v44 = vadd.f32 %v963_v51, %v878_v52 }
 0x2ca   :  { %v1102_v53 = vpop.f32.mrf.mxu0 }
 0x2cb   :  { %v884_v54 = vpack.c.bf16 %v879_v44, %v879_v44 }
 0x2cc   :  { %v881_v55 = vpop.f32.mrf.mxu0 }
 0x2cd   :  { %885 = vst [vmem:[#allocation10] sm:$0xf] %v884_v54 }
 0x2ce   :  { %v1103_v56 = vpop.f32.mrf.mxu0 }
 0x2cf   :  { %1269 = shalt.err (!%p1266_p10)
}
 0x2d0   :  { %895 = dma.vmem_to_hbm [thread:$0]  %s893_s25, 64, %s1398_s7, [#allocation4]  }
 0x2d1   :  { %1284 = dma.done.wait [#allocation4], 64  }
 0x2d2   :  { %1285 = vsyncadd [#allocation4], 4294967232 }
 0x2d3   :  { %899 = vsyncpa [#allocation3], 1 }
 0x2d4   :  { %900 = vsyncpa [#allocation6], 1 }
 0x2d5   :  { %901 = vsyncpa [#allocation9], 1 }
 0x2d6   :  { %902 = vsyncpa [#allocation4], 1 }

</bundles_post_ra>
